<compile_context>
chip_gen: v6e
topology: v6e:2x2x1
jax: 0.10.0
libtpu: 0.0.40
codegen_flags: <defaults>
</compile_context>

<pallas_src>
import jax
import jax.numpy as jnp
from jax import lax
from jax.experimental import pallas as pl
from jax.experimental.pallas import tpu as pltpu

_EPS = 1e-08
_LANES = 128
# ~2 MiB per input per pipeline buffer: f32 -> 4096 rows, bf16 -> 8192 rows.
_BLOCK_BYTES = 2 * 1024 * 1024


def _cdiv(a, b):
    return -(-a // b)


def _round_up(a, b):
    return _cdiv(a, b) * b


def _sublane_multiple(dtype):
    # f32 -> 8, bf16/f16 -> 16, int8/fp8 -> 32 sublane tiling granularity.
    itemsize = jnp.dtype(dtype).itemsize
    return max(8, 32 // itemsize)


def _num_tensorcores():
    # The 2-way core split only helps on multi-TensorCore chips (v7x); on
    # v5e/v6e (1 TC) it is pure grid fragmentation, so default to 1.
    try:
        kind = (getattr(jax.devices()[0], "device_kind", "") or "").lower()
    except Exception:
        kind = ""
    return 2 if "v7" in kind else 1


def _make_partial_sums_kernel(steps, block_rows, rows_in_array, needs_mask):
    """Builds a kernel accumulating five raw-moment sums into a (5,8,128) tile.

    Grid = (core, step); the output block index depends only on `core`, so the
    (5, 8, 128) tile stays resident in VMEM across the `step` (reduction) axis.
    """

    def kernel(x_ref, y_ref, o_ref):
        s = pl.program_id(1)

        @pl.when(s == 0)
        def _():
            o_ref[...] = jnp.zeros_like(o_ref)

        x = x_ref[...].astype(jnp.float32)
        y = y_ref[...].astype(jnp.float32)

        if needs_mask:
            # Ragged tail: rows at/after `rows_in_array` hold unspecified data
            # from the partial / clamped block DMA; zero them so every raw sum
            # stays exact.  Emitted only when the grid over-covers the array.
            c = pl.program_id(0)
            row0 = (c * steps + s) * block_rows
            rid = row0 + lax.broadcasted_iota(jnp.int32, (block_rows, _LANES), 0)
            valid = rid < rows_in_array
            x = jnp.where(valid, x, 0.0)
            y = jnp.where(valid, y, 0.0)

        d = x - y

        def fold(v):
            # (block_rows, 128) -> (block_rows//8, 8, 128) -> sum over axis 0.
            # Pure VPU vector adds; cross-lane reduction deferred to epilogue.
            return jnp.sum(v.reshape(-1, 8, _LANES), axis=0)

        # sum(x*y) is intentionally NOT streamed: it is reconstructed in the
        # epilogue as (sxx + syy - ssd)/2, trimming VALU work per element.
        o_ref[0] += fold(x)
        o_ref[1] += fold(y)
        o_ref[2] += fold(x * x)
        o_ref[3] += fold(y * y)
        o_ref[4] += fold(d * d)   # direct (x-y)^2 keeps MSE numerically exact

    return kernel


def pearson_rmse_loss(output, target, epsilon=_EPS):
    """Pallas TPU implementation of PearsonRMSELoss.forward(output, target)."""
    assert output.shape == target.shape, "output/target shapes must match"
    n_total = output.size

    sub = max(_sublane_multiple(output.dtype), _sublane_multiple(target.dtype))
    itemsize = max(jnp.dtype(output.dtype).itemsize,
                   jnp.dtype(target.dtype).itemsize)
    max_block_rows = _round_up(max(sub, _BLOCK_BYTES // (_LANES * itemsize)), sub)

    rows_needed = _cdiv(n_total, _LANES)
    ncores = _num_tensorcores()
    if rows_needed < 2 * sub:
        ncores = 1   # too small to be worth splitting across TensorCores

    block_rows = min(max_block_rows, _round_up(_cdiv(rows_needed, ncores), sub))
    steps = _cdiv(rows_needed, ncores * block_rows)

    # Minimal padding only: to a 128-lane multiple when strictly required for
    # the (rows, 128) reshape, and up to one sublane group for tiny inputs.
    # The ragged last grid block is masked inside the kernel instead of being
    # zero-padded in HBM.
    rows_in_array = max(rows_needed, sub)
    pad = rows_in_array * _LANES - n_total

    def prep(a):
        flat = jnp.reshape(a, (-1,))
        if pad:
            flat = jnp.pad(flat, (0, pad))   # zero pads contribute 0 to all sums
        return jnp.reshape(flat, (rows_in_array, _LANES))

    x2d = prep(output)   # native dtype; f32 cast happens on registers in-kernel
    y2d = prep(target)

    needs_mask = ncores * steps * block_rows > rows_in_array
    kernel = _make_partial_sums_kernel(steps, block_rows, rows_in_array,
                                       needs_mask)

    if ncores > 1:
        # Real 2-TensorCore sharding on v7x (fallback keeps it compiling).
        dim_sems = (getattr(pltpu, "CORE_PARALLEL", "parallel"), "arbitrary")
    else:
        dim_sems = ("arbitrary", "arbitrary")

    cost = pl.CostEstimate(
        flops=9 * n_total,
        transcendentals=0,
        bytes_accessed=int(x2d.size) * x2d.dtype.itemsize
        + int(y2d.size) * y2d.dtype.itemsize
        + ncores * 5 * 8 * _LANES * 4,
    )

    partials = pl.pallas_call(
        kernel,
        out_shape=jax.ShapeDtypeStruct((ncores, 5, 8, _LANES), jnp.float32),
        grid_spec=pltpu.PrefetchScalarGridSpec(
            num_scalar_prefetch=0,
            grid=(ncores, steps),
            in_specs=[
                pl.BlockSpec((block_rows, _LANES),
                             lambda c, s: (c * steps + s, 0)),
                pl.BlockSpec((block_rows, _LANES),
                             lambda c, s: (c * steps + s, 0)),
            ],
            # Per-core accumulator tile; leading core dim squeezed in-kernel.
            out_specs=pl.BlockSpec((None, 5, 8, _LANES),
                                   lambda c, s: (c, 0, 0, 0)),
        ),
        compiler_params=pltpu.CompilerParams(
            dimension_semantics=dim_sems,
        ),
        cost_estimate=cost,
    )(x2d, y2d)

    # Tiny epilogue in plain JAX: combine cores + lanes, then scalar math.
    sums = jnp.sum(partials, axis=(0, 2, 3))          # (5,)
    sx, sy, sxx, syy, ssd = (sums[i] for i in range(5))

    n = jnp.float32(n_total)
    sxy = 0.5 * (sxx + syy - ssd)    # sum(x*y), reconstructed (see kernel note)
    mx = sx / n
    my = sy / n
    vxx = sxx - n * mx * mx          # sum((x - mean_x)^2)
    vyy = syy - n * my * my          # sum((y - mean_y)^2)
    vxy = sxy - n * mx * my          # sum((x - mean_x)*(y - mean_y))

    pearson = vxy / (jnp.sqrt(vxx + epsilon) * jnp.sqrt(vyy + epsilon))
    mse = ssd / n
    return mse + (1.0 - pearson)


def _reference(output, target, epsilon=_EPS):
    # Pure-JAX reference mirroring the PyTorch module.
    x = output.astype(jnp.float32)
    y = target.astype(jnp.float32)
    mse = jnp.mean((x - y) ** 2)
    vx = x - jnp.mean(x)
    vy = y - jnp.mean(y)
    pearson = jnp.sum(vx * vy) / (
        jnp.sqrt(jnp.sum(vx**2) + epsilon) * jnp.sqrt(jnp.sum(vy**2) + epsilon)
    )
    return mse + (1.0 - pearson)


if __name__ == "__main__":
    key = jax.random.PRNGKey(0)
    k1, k2, k3, k4, k5, k6 = jax.random.split(key, 6)

    # NCHW inputs: batch=2, channels=4, spatial=16x16 (2048 elements, aligned).
    shape = (2, 4, 16, 16)
    output = jax.random.normal(k1, shape, dtype=jnp.float32)
    target = 0.7 * output + 0.3 * jax.random.normal(k2, shape, dtype=jnp.float32)

    loss = jax.block_until_ready(pearson_rmse_loss(output, target))
    ref = _reference(output, target)
    assert jnp.allclose(loss, ref, rtol=1e-5, atol=1e-5), (loss, ref)

    # Ragged element count (210, not a multiple of 128): tiny-pad path.
    shape2 = (2, 3, 7, 5)
    o2 = jax.random.normal(k3, shape2, dtype=jnp.float32)
    t2 = 0.5 * o2 + 0.5 * jax.random.normal(k4, shape2, dtype=jnp.float32)
    loss2 = jax.block_until_ready(pearson_rmse_loss(o2, t2))
    ref2 = _reference(o2, t2)
    assert jnp.allclose(loss2, ref2, rtol=1e-5, atol=1e-5), (loss2, ref2)

    # bf16 inputs: streamed in native dtype, cast to f32 inside the kernel.
    o3 = output.astype(jnp.bfloat16)
    t3 = target.astype(jnp.bfloat16)
    loss3 = jax.block_until_ready(pearson_rmse_loss(o3, t3))
    ref3 = _reference(o3, t3)
    assert jnp.allclose(loss3, ref3, rtol=1e-5, atol=1e-5), (loss3, ref3)

    # 1280 elements = 10 rows of 128: exercises the in-kernel ragged-row mask
    # (block taller than the array, no wrapper-side padding).
    shape4 = (2, 5, 8, 16)
    o4 = jax.random.normal(k5, shape4, dtype=jnp.float32)
    t4 = 0.6 * o4 + 0.4 * jax.random.normal(k6, shape4, dtype=jnp.float32)
    loss4 = jax.block_until_ready(pearson_rmse_loss(o4, t4))
    ref4 = _reference(o4, t4)
    assert jnp.allclose(loss4, ref4, rtol=1e-5, atol=1e-5), (loss4, ref4)

    print("KERNEL_OK")
</pallas_src>

<mosaic_0001>
module attributes {stable_mosaic.version = 11 : i64} {
  func.func @kernel(%arg0: i32, %arg1: i32, %arg2: memref<16x128xf32, #tpu.memory_space<vmem>>, %arg3: memref<16x128xf32, #tpu.memory_space<vmem>>, %arg4: memref<1x5x8x128xf32, #tpu.memory_space<vmem>>) attributes {dimension_semantics = [#tpu.dimension_semantics<arbitrary>, #tpu.dimension_semantics<arbitrary>], iteration_bounds = array<i64: 1, 1>, scalar_prefetch = 0 : i64, scratch_operands = 0 : i64, tpu.core_type = #tpu.core_type<tc>, window_params = [{transform_indices = @transform_0, window_bounds = array<i64: 16, 128>}, {transform_indices = @transform_1, window_bounds = array<i64: 16, 128>}, {transform_indices = @transform_2, window_bounds = array<i64: 1, 5, 8, 128>}]} {
    %c0_i32 = arith.constant 0 : i32
    %0 = arith.cmpi eq, %arg1, %c0_i32 : i32
    %1 = arith.extui %0 : i1 to i32
    %c0_i32_0 = arith.constant 0 : i32
    %2 = arith.cmpi ne, %1, %c0_i32_0 : i32
    scf.if %2 {
      %cst_44 = arith.constant 0.000000e+00 : f32
      %49 = vector.broadcast %cst_44 : f32 to vector<5x8x128xf32>
      %c0_45 = arith.constant 0 : index
      %c0_46 = arith.constant 0 : index
      %c0_47 = arith.constant 0 : index
      %c0_48 = arith.constant 0 : index
      %50 = vector.load %arg4[%c0_45, %c0_46, %c0_47, %c0_48] : memref<1x5x8x128xf32, #tpu.memory_space<vmem>>, vector<1x5x8x128xf32>
      %51 = vector.shape_cast %50 : vector<1x5x8x128xf32> to vector<5x8x128xf32>
      %52 = vector.shape_cast %49 : vector<5x8x128xf32> to vector<1x5x8x128xf32>
      tpu.vector_store %arg4[%c0_45, %c0_46, %c0_47, %c0_48], %52 {strides = array<i32>} : memref<1x5x8x128xf32, #tpu.memory_space<vmem>>, vector<1x5x8x128xf32>,
    } else {
    }
    %c0 = arith.constant 0 : index
    %c0_1 = arith.constant 0 : index
    %3 = vector.load %arg2[%c0, %c0_1] : memref<16x128xf32, #tpu.memory_space<vmem>>, vector<16x128xf32>
    %c0_2 = arith.constant 0 : index
    %c0_3 = arith.constant 0 : index
    %4 = vector.load %arg3[%c0_2, %c0_3] : memref<16x128xf32, #tpu.memory_space<vmem>>, vector<16x128xf32>
    %5 = arith.subf %3, %4 : vector<16x128xf32>
    %c0_4 = arith.constant 0 : index
    %c0_5 = arith.constant 0 : index
    %c0_6 = arith.constant 0 : index
    %c0_7 = arith.constant 0 : index
    %6 = vector.load %arg4[%c0_4, %c0_5, %c0_6, %c0_7] : memref<1x5x8x128xf32, #tpu.memory_space<vmem>>, vector<1x1x8x128xf32>
    %7 = vector.shape_cast %6 : vector<1x1x8x128xf32> to vector<8x128xf32>
    %8 = vector.shape_cast %3 : vector<16x128xf32> to vector<2x8x128xf32>
    %cst = arith.constant dense<0.000000e+00> : vector<8x128xf32>
    %9 = vector.multi_reduction <add>, %8, %cst [0] : vector<2x8x128xf32> to vector<8x128xf32>
    %10 = arith.addf %7, %9 : vector<8x128xf32>
    %c0_8 = arith.constant 0 : index
    %c0_9 = arith.constant 0 : index
    %c0_10 = arith.constant 0 : index
    %c0_11 = arith.constant 0 : index
    %11 = vector.load %arg4[%c0_8, %c0_9, %c0_10, %c0_11] : memref<1x5x8x128xf32, #tpu.memory_space<vmem>>, vector<1x1x8x128xf32>
    %12 = vector.shape_cast %11 : vector<1x1x8x128xf32> to vector<8x128xf32>
    %13 = vector.shape_cast %10 : vector<8x128xf32> to vector<1x1x8x128xf32>
    tpu.vector_store %arg4[%c0_8, %c0_9, %c0_10, %c0_11], %13 {strides = array<i32>} : memref<1x5x8x128xf32, #tpu.memory_space<vmem>>, vector<1x1x8x128xf32>,
    %c0_12 = arith.constant 0 : index
    %c1 = arith.constant 1 : index
    %c0_13 = arith.constant 0 : index
    %c0_14 = arith.constant 0 : index
    %14 = vector.load %arg4[%c0_12, %c1, %c0_13, %c0_14] : memref<1x5x8x128xf32, #tpu.memory_space<vmem>>, vector<1x1x8x128xf32>
    %15 = vector.shape_cast %14 : vector<1x1x8x128xf32> to vector<8x128xf32>
    %16 = vector.shape_cast %4 : vector<16x128xf32> to vector<2x8x128xf32>
    %cst_15 = arith.constant dense<0.000000e+00> : vector<8x128xf32>
    %17 = vector.multi_reduction <add>, %16, %cst_15 [0] : vector<2x8x128xf32> to vector<8x128xf32>
    %18 = arith.addf %15, %17 : vector<8x128xf32>
    %c0_16 = arith.constant 0 : index
    %c1_17 = arith.constant 1 : index
    %c0_18 = arith.constant 0 : index
    %c0_19 = arith.constant 0 : index
    %19 = vector.load %arg4[%c0_16, %c1_17, %c0_18, %c0_19] : memref<1x5x8x128xf32, #tpu.memory_space<vmem>>, vector<1x1x8x128xf32>
    %20 = vector.shape_cast %19 : vector<1x1x8x128xf32> to vector<8x128xf32>
    %21 = vector.shape_cast %18 : vector<8x128xf32> to vector<1x1x8x128xf32>
    tpu.vector_store %arg4[%c0_16, %c1_17, %c0_18, %c0_19], %21 {strides = array<i32>} : memref<1x5x8x128xf32, #tpu.memory_space<vmem>>, vector<1x1x8x128xf32>,
    %c0_20 = arith.constant 0 : index
    %c2 = arith.constant 2 : index
    %c0_21 = arith.constant 0 : index
    %c0_22 = arith.constant 0 : index
    %22 = vector.load %arg4[%c0_20, %c2, %c0_21, %c0_22] : memref<1x5x8x128xf32, #tpu.memory_space<vmem>>, vector<1x1x8x128xf32>
    %23 = vector.shape_cast %22 : vector<1x1x8x128xf32> to vector<8x128xf32>
    %24 = arith.mulf %3, %3 : vector<16x128xf32>
    %25 = vector.shape_cast %24 : vector<16x128xf32> to vector<2x8x128xf32>
    %cst_23 = arith.constant dense<0.000000e+00> : vector<8x128xf32>
    %26 = vector.multi_reduction <add>, %25, %cst_23 [0] : vector<2x8x128xf32> to vector<8x128xf32>
    %27 = arith.addf %23, %26 : vector<8x128xf32>
    %c0_24 = arith.constant 0 : index
    %c2_25 = arith.constant 2 : index
    %c0_26 = arith.constant 0 : index
    %c0_27 = arith.constant 0 : index
    %28 = vector.load %arg4[%c0_24, %c2_25, %c0_26, %c0_27] : memref<1x5x8x128xf32, #tpu.memory_space<vmem>>, vector<1x1x8x128xf32>
    %29 = vector.shape_cast %28 : vector<1x1x8x128xf32> to vector<8x128xf32>
    %30 = vector.shape_cast %27 : vector<8x128xf32> to vector<1x1x8x128xf32>
    tpu.vector_store %arg4[%c0_24, %c2_25, %c0_26, %c0_27], %30 {strides = array<i32>} : memref<1x5x8x128xf32, #tpu.memory_space<vmem>>, vector<1x1x8x128xf32>,
    %c0_28 = arith.constant 0 : index
    %c3 = arith.constant 3 : index
    %c0_29 = arith.constant 0 : index
    %c0_30 = arith.constant 0 : index
    %31 = vector.load %arg4[%c0_28, %c3, %c0_29, %c0_30] : memref<1x5x8x128xf32, #tpu.memory_space<vmem>>, vector<1x1x8x128xf32>
    %32 = vector.shape_cast %31 : vector<1x1x8x128xf32> to vector<8x128xf32>
    %33 = arith.mulf %4, %4 : vector<16x128xf32>
    %34 = vector.shape_cast %33 : vector<16x128xf32> to vector<2x8x128xf32>
    %cst_31 = arith.constant dense<0.000000e+00> : vector<8x128xf32>
    %35 = vector.multi_reduction <add>, %34, %cst_31 [0] : vector<2x8x128xf32> to vector<8x128xf32>
    %36 = arith.addf %32, %35 : vector<8x128xf32>
    %c0_32 = arith.constant 0 : index
    %c3_33 = arith.constant 3 : index
    %c0_34 = arith.constant 0 : index
    %c0_35 = arith.constant 0 : index
    %37 = vector.load %arg4[%c0_32, %c3_33, %c0_34, %c0_35] : memref<1x5x8x128xf32, #tpu.memory_space<vmem>>, vector<1x1x8x128xf32>
    %38 = vector.shape_cast %37 : vector<1x1x8x128xf32> to vector<8x128xf32>
    %39 = vector.shape_cast %36 : vector<8x128xf32> to vector<1x1x8x128xf32>
    tpu.vector_store %arg4[%c0_32, %c3_33, %c0_34, %c0_35], %39 {strides = array<i32>} : memref<1x5x8x128xf32, #tpu.memory_space<vmem>>, vector<1x1x8x128xf32>,
    %c0_36 = arith.constant 0 : index
    %c4 = arith.constant 4 : index
    %c0_37 = arith.constant 0 : index
    %c0_38 = arith.constant 0 : index
    %40 = vector.load %arg4[%c0_36, %c4, %c0_37, %c0_38] : memref<1x5x8x128xf32, #tpu.memory_space<vmem>>, vector<1x1x8x128xf32>
    %41 = vector.shape_cast %40 : vector<1x1x8x128xf32> to vector<8x128xf32>
    %42 = arith.mulf %5, %5 : vector<16x128xf32>
    %43 = vector.shape_cast %42 : vector<16x128xf32> to vector<2x8x128xf32>
    %cst_39 = arith.constant dense<0.000000e+00> : vector<8x128xf32>
    %44 = vector.multi_reduction <add>, %43, %cst_39 [0] : vector<2x8x128xf32> to vector<8x128xf32>
    %45 = arith.addf %41, %44 : vector<8x128xf32>
    %c0_40 = arith.constant 0 : index
    %c4_41 = arith.constant 4 : index
    %c0_42 = arith.constant 0 : index
    %c0_43 = arith.constant 0 : index
    %46 = vector.load %arg4[%c0_40, %c4_41, %c0_42, %c0_43] : memref<1x5x8x128xf32, #tpu.memory_space<vmem>>, vector<1x1x8x128xf32>
    %47 = vector.shape_cast %46 : vector<1x1x8x128xf32> to vector<8x128xf32>
    %48 = vector.shape_cast %45 : vector<8x128xf32> to vector<1x1x8x128xf32>
    tpu.vector_store %arg4[%c0_40, %c4_41, %c0_42, %c0_43], %48 {strides = array<i32>} : memref<1x5x8x128xf32, #tpu.memory_space<vmem>>, vector<1x1x8x128xf32>,
    return
  }
  func.func @transform_0(%arg0: i32, %arg1: i32) -> (i32, i32) {
    %c1_i32 = arith.constant 1 : i32
    %0 = arith.muli %arg0, %c1_i32 : i32
    %1 = arith.addi %0, %arg1 : i32
    %c0_i32 = arith.constant 0 : i32
    %c0_i32_0 = arith.constant 0 : i32
    return %1, %c0_i32 : i32, i32
  }
  func.func @transform_1(%arg0: i32, %arg1: i32) -> (i32, i32) {
    %c1_i32 = arith.constant 1 : i32
    %0 = arith.muli %arg0, %c1_i32 : i32
    %1 = arith.addi %0, %arg1 : i32
    %c0_i32 = arith.constant 0 : i32
    %c0_i32_0 = arith.constant 0 : i32
    return %1, %c0_i32 : i32, i32
  }
  func.func @transform_2(%arg0: i32, %arg1: i32) -> (i32, i32, i32, i32) {
    %c0_i32 = arith.constant 0 : i32
    %c0_i32_0 = arith.constant 0 : i32
    %c0_i32_1 = arith.constant 0 : i32
    %c0_i32_2 = arith.constant 0 : i32
    return %arg0, %c0_i32, %c0_i32_0, %c0_i32_1 : i32, i32, i32, i32
  }
}

</mosaic_0001>

<bundles_post_ra>
// kernel: tpu_custom_call.1
= control target key start
LH: loop header
LB: loop body
LE: loop exit
PB: predicated region body
PF: predicated region fallthrough
CT: control target
= control target key end

     0   :  { %7 = vsyncpa [#allocation3], 0  ;;  %s225_s0 = inlined_call_operand.hbm [shape: f32[16,128], index: 0, kind: input, shape index: {}]   ;;  %s226_s1 = inlined_call_operand.hbm [shape: f32[16,128], index: 1, kind: input, shape index: {}]   ;;  %s227_s2 = inlined_call_operand.hbm [shape: f32[1,5,8,128], index: 2, kind: output, shape index: {}]  }
   0x1   :  { %8 = vsyncpa [#allocation6], 0 }
   0x2   :  { %9 = vsyncpa [#allocation4], 0  ;;  %s187_s9 = smov [#allocation2]  }
   0x3   :  { %s19_s10 = sshll.u32 %s187_s9, 4  ;;  %s20_s10 = int_to_ptr.vmem [resolvable:$true] %s19_s10 }
   0x4   :  { %s129_s11 = scalar_lea.vmem %s20_s10, 256  ;;  %p134_p1 = scmp.lt.s32.totalorder %s20_s10, %s20_s10 }
   0x5   :  { %p130_p0 = scmp.ne.s32.totalorder %s20_s10, %s129_s11  ;;  %p135_p2 = scmp.lt.s32.totalorder %s129_s11, %s129_s11 }
   0x7   :  { %p136_p3 = por %p135_p2, %p134_p1 }
   0x9   :  { %p137_p4 = pnand %p136_p3, %p130_p0 }
   0xb   :  { %140 = shalt.err (!%p137_p4)
}
   0xc   :  { %s188_s12 = smov 128   ;;  %s189_s13 = smov 8  }
   0xd   :  { %25 = dma.hbm_to_vmem [thread:$0]  %s225_s0, 256, %s20_s10, [#allocation3], %s188_s12, %s188_s12, %s189_s13  }
   0xe   :  { %s190_s16 = smov [#allocation5]  }
   0xf   :  { %s35_s17 = sshll.u32 %s190_s16, 4  ;;  %s36_s17 = int_to_ptr.vmem [resolvable:$true] %s35_s17 }
  0x10   :  { %s149_s18 = scalar_lea.vmem %s36_s17, 256  ;;  %p154_p6 = scmp.lt.s32.totalorder %s36_s17, %s36_s17 }
  0x11   :  { %p150_p5 = scmp.ne.s32.totalorder %s36_s17, %s149_s18  ;;  %p155_p7 = scmp.lt.s32.totalorder %s149_s18, %s149_s18 }
  0x13   :  { %p156_p8 = por %p155_p7, %p154_p6 }
  0x15   :  { %p157_p9 = pnand %p156_p8, %p150_p5 }
  0x17   :  { %160 = shalt.err (!%p157_p9)
}
  0x18   :  { %41 = dma.hbm_to_vmem [thread:$0]  %s226_s1, 256, %s36_s17, [#allocation6], %s188_s12, %s188_s12, %s189_s13  }
  0x19   :  { %181 = dma.done.wait [#allocation3], 256  }
  0x1a   :  { %182 = vsyncadd [#allocation3], 4294967040 }
  0x1b   :  { %183 = dma.done.wait [#allocation6], 256  }
  0x1c   :  { %184 = vsyncadd [#allocation6], 4294967040  ;;  %v61_v0 = vld [vmem:[#allocation2] sm:$0xff]  ;;  %v62_v1 = vld [vmem:[#allocation2 + $0x8] sm:$0xff]  ;;  %s191_s0 = smov [#allocation7]  }
  0x1d   :  { %v63_v2 = vld [vmem:[#allocation5] sm:$0xff]  ;;  %v68_v3 = vadd.f32 %v62_v1, %v61_v0  ;;  %v64_v4 = vld [vmem:[#allocation5 + $0x8] sm:$0xff]  ;;  %v78_v5 = vmul.f32 %v61_v0, %v61_v0  ;;  %v79_v6 = vmul.f32 %v62_v1, %v62_v1  ;;  %s102_s1 = sshll.u32 %s191_s0, 4  ;;  %s103_s1 = int_to_ptr.vmem [resolvable:$true] %s102_s1 }
  0x1e   :  { %v85_v7 = vmul.f32 %v63_v2, %v63_v2  ;;  %v73_v8 = vadd.f32 %v64_v4, %v63_v2  ;;  %v86_v9 = vmul.f32 %v64_v4, %v64_v4  ;;  %v65_v10 = vsub.f32 %v61_v0, %v63_v2  ;;  %s161_s21 = scalar_lea.vmem %s103_s1, 640  ;;  %p166_p11 = scmp.lt.s32.totalorder %s103_s1, %s103_s1 }
  0x1f   :  { %v66_v11 = vsub.f32 %v62_v1, %v64_v4  ;;  %v80_v12 = vadd.f32 %v79_v6, %v78_v5  ;;  %70 = vst [vmem:[#allocation7] sm:$0xff] %v68_v3  ;;  %p162_p10 = scmp.ne.s32.totalorder %s103_s1, %s161_s21  ;;  %p167_p12 = scmp.lt.s32.totalorder %s161_s21, %s161_s21 }
  0x20   :  { %v87_v13 = vadd.f32 %v86_v9, %v85_v7  ;;  %v92_v14 = vmul.f32 %v65_v10, %v65_v10  ;;  %75 = vst [vmem:[#allocation7 + $0x8] sm:$0xff] %v73_v8 }
  0x21   :  { %v93_v15 = vmul.f32 %v66_v11, %v66_v11  ;;  %82 = vst [vmem:[#allocation7 + $0x10] sm:$0xff] %v80_v12  ;;  %p168_p13 = por %p167_p12, %p166_p11 }
  0x22   :  { %89 = vst [vmem:[#allocation7 + $0x18] sm:$0xff] %v87_v13 }
  0x23   :  { %v94_v16 = vadd.f32 %v93_v15, %v92_v14  ;;  %p169_p0 = pnand %p168_p13, %p162_p10 }
  0x25   :  { %96 = vst [vmem:[#allocation7 + $0x20] sm:$0xff] %v94_v16 }
  0x26   :  { %172 = shalt.err (!%p169_p0)
}
  0x27   :  { %108 = dma.vmem_to_hbm [thread:$0]  %s103_s1, 640, %s227_s2, [#allocation4], %s188_s12, %s188_s12, %s189_s13  }
  0x28   :  { %185 = dma.done.wait [#allocation4], 640  }
  0x29   :  { %186 = vsyncadd [#allocation4], 4294966656 }
  0x2a   :  { %112 = vsyncpa [#allocation3], 1 }
  0x2b   :  { %113 = vsyncpa [#allocation6], 1 }
  0x2c   :  { %114 = vsyncpa [#allocation4], 1 }

</bundles_post_ra>
